<compile_context>
chip_gen: v6e
topology: v6e:2x2x1
jax: 0.10.0
libtpu: 0.0.40
codegen_flags: <defaults>
</compile_context>

<pallas_src>
import jax
import jax.numpy as jnp
from jax.experimental import pallas as pl
from jax.experimental.pallas import tpu as pltpu


# ----------------------------- kernels --------------------------------------


def _stats_kernel(x_ref, rm_ref, sum_ref, sqsum_ref):
    """Per-(n, c-block) partial sums of (x - running_mean) and its square.

    Grid: (N, C//c_tile, HW//hw_tile).  The last axis is the reduction axis,
    so the (1, c_tile, 1) accumulators stay resident across it; init happens
    at every t==0 (per (n, c) block), which stays race-free when the N / C
    axes are sharded across TensorCores.
    """
    @pl.when(pl.program_id(2) == 0)
    def _init():
        sum_ref[...] = jnp.zeros_like(sum_ref)
        sqsum_ref[...] = jnp.zeros_like(sqsum_ref)

    # Shift by the running mean for numerically robust variance.
    xc = x_ref[...].astype(jnp.float32) - rm_ref[...]         # (1, c_tile, hw)
    sum_ref[...] += jnp.sum(xc, axis=2, keepdims=True)        # (1, c_tile, 1)
    sqsum_ref[...] += jnp.sum(xc * xc, axis=2, keepdims=True)


def _apply_kernel(x_ref, scale_ref, shift_ref, y_ref):
    """y = x * scale + shift; single FMA per element, no extra passes."""
    x = x_ref[...].astype(jnp.float32)                        # (1, c_tile, hw)
    y_ref[...] = (x * scale_ref[...] + shift_ref[...]).astype(y_ref.dtype)


# ----------------------------- tiling helpers --------------------------------


def _scoped_vmem_bytes():
    """Generation-aware scoped-VMEM request (half of physical, <= 64 MiB)."""
    phys = None
    try:
        phys = getattr(pltpu.get_tpu_info(), "vmem_capacity_bytes", None)
    except Exception:
        phys = None
    if not phys:
        phys = 64 * 1024 * 1024          # conservative: v7x physical VMEM / TC
    return int(min(phys // 2, 64 * 1024 * 1024))


def _c_candidates(C):
    """Channel-tile candidates: divisors of C that are multiples of 8, plus C."""
    cands = {C}
    for c in range(8, C, 8):
        if C % c == 0:
            cands.add(c)
    return sorted(cands)


def _pick_tiles(C, HW, itemsize, tile_budget):
    """Pick (c_tile, hw_tile) such that c_tile*hw_tile*itemsize <= budget,
    hw_tile is a multiple of 128 dividing HW (or the full HW when HW%128!=0),
    and the lane width stays >= min(HW, 512) whenever possible."""
    cands = _c_candidates(C)

    if HW % 128 != 0:
        # Full-HW lane tile (legal full-dim block); honor the budget via C.
        # TODO(synk): lane widths < 128 here produce masked stores; padding +
        # in-kernel masking would restore lane-dense stores for tiny HW.
        hw_tile = HW
        fitting = [c for c in cands if c * hw_tile * itemsize <= tile_budget]
        c_tile = max(fitting) if fitting else min(cands)
        return c_tile, hw_tile

    # Keep >= 512 lanes (measured ~85% of HBM roofline) by shrinking C first.
    min_lanes = min(HW, 512)
    fitting = [c for c in cands if c * min_lanes * itemsize <= tile_budget]
    c_tile = max(fitting) if fitting else min(cands)

    cap = max(128, tile_budget // max(c_tile * itemsize, 1))
    hw_tile = 128
    t = 256
    limit = min(HW, cap)
    while t <= limit:
        if HW % t == 0:
            hw_tile = t
        t += 128
    return c_tile, hw_tile


# ----------------------------- wrapper ---------------------------------------


def batch_renorm2d_train(x, gamma, beta, running_avg_mean, running_avg_std,
                         *, eps=1e-5, momentum=0.01, r_max=1.0, d_max=0.0,
                         r_max_inc_step=1e-4, d_max_inc_step=1e-4,
                         max_r_max=3.0, max_d_max=5.0,
                         _tile_budget_bytes=None):
    """Training-mode BatchRenorm2D forward.

    Args:
      x: (N, C, H, W); gamma/beta/running_avg_mean/running_avg_std: (1, C, 1, 1).
    Returns:
      y, new_running_avg_mean, new_running_avg_std, new_r_max, new_d_max.
    """
    N, C, H, W = x.shape
    HW = H * W
    L = float(N * HW)
    itemsize = jnp.dtype(x.dtype).itemsize

    scoped_vmem = _scoped_vmem_bytes()
    # Apply pass keeps x-tile + y-tile, each double-buffered (4 live tiles);
    # leave ~30% headroom for scale/shift tiles and compiler-internal scratch.
    tile_budget = (_tile_budget_bytes if _tile_budget_bytes is not None
                   else (scoped_vmem * 7) // (10 * 4))
    c_tile, hw_tile = _pick_tiles(C, HW, itemsize, tile_budget)
    num_c = C // c_tile
    num_t = HW // hw_tile

    x3 = x.reshape(N, C, HW)                       # free, contiguous reshape
    rm = running_avg_mean.reshape(1, C).astype(jnp.float32)
    rs = running_avg_std.reshape(1, C).astype(jnp.float32)
    g = gamma.reshape(1, C).astype(jnp.float32)
    b = beta.reshape(1, C).astype(jnp.float32)
    rm3 = rm.reshape(1, C, 1)

    # ---- pass 1: per-(n, c-block) partial sums (reduction over HW-tiles) ----
    stats_cost = pl.CostEstimate(
        flops=int(4 * N * C * HW), transcendentals=0,
        bytes_accessed=int(N * C * HW * itemsize + 2 * N * C * 4 + C * 4))

    sum_part, sq_part = pl.pallas_call(
        _stats_kernel,
        grid=(N, num_c, num_t),
        in_specs=[
            pl.BlockSpec((1, c_tile, hw_tile), lambda n, c, t: (n, c, t)),
            pl.BlockSpec((1, c_tile, 1), lambda n, c, t: (0, c, 0)),
        ],
        out_specs=(pl.BlockSpec((1, c_tile, 1), lambda n, c, t: (n, c, 0)),
                   pl.BlockSpec((1, c_tile, 1), lambda n, c, t: (n, c, 0))),
        out_shape=(jax.ShapeDtypeStruct((N, C, 1), jnp.float32),
                   jax.ShapeDtypeStruct((N, C, 1), jnp.float32)),
        compiler_params=pltpu.CompilerParams(
            dimension_semantics=("parallel", "parallel", "arbitrary"),
            vmem_limit_bytes=int(scoped_vmem)),
        cost_estimate=stats_cost,
    )(x3, rm3)

    # ---- O(C) math in plain JAX: stats, r/d clamps, EMA, folded affine ------
    s = jnp.sum(sum_part, axis=0).reshape(1, C)          # sum of (x - rm)
    sq = jnp.sum(sq_part, axis=0).reshape(1, C)          # sum of (x - rm)^2
    mean_c = s / L
    mean = rm + mean_c
    var = jnp.maximum(sq / L - mean_c * mean_c, 0.0)     # biased variance
    std = jnp.sqrt(var + eps)

    r = jnp.clip(std / rs, 1.0 / r_max, r_max)
    d = jnp.clip((mean - rm) / rs, -d_max, d_max)

    r_over_std = r / std
    scale = (g * r_over_std).reshape(1, C, 1)
    shift = (g * (d - mean * r_over_std) + b).reshape(1, C, 1)

    new_rm = rm + momentum * (mean - rm)
    new_rs = rs + momentum * (std - rs)

    # ---- pass 2: streaming per-channel affine (fully parallel grid) ---------
    apply_cost = pl.CostEstimate(
        flops=int(2 * N * C * HW), transcendentals=0,
        bytes_accessed=int(2 * N * C * HW * itemsize + 2 * C * 4))

    y3 = pl.pallas_call(
        _apply_kernel,
        grid=(N, num_c, num_t),
        in_specs=[
            pl.BlockSpec((1, c_tile, hw_tile), lambda n, c, t: (n, c, t)),
            pl.BlockSpec((1, c_tile, 1), lambda n, c, t: (0, c, 0)),
            pl.BlockSpec((1, c_tile, 1), lambda n, c, t: (0, c, 0)),
        ],
        out_specs=pl.BlockSpec((1, c_tile, hw_tile), lambda n, c, t: (n, c, t)),
        out_shape=jax.ShapeDtypeStruct((N, C, HW), x.dtype),
        compiler_params=pltpu.CompilerParams(
            dimension_semantics=("parallel", "parallel", "parallel"),
            vmem_limit_bytes=int(scoped_vmem)),
        cost_estimate=apply_cost,
    )(x3, scale, shift)

    y = y3.reshape(N, C, H, W)

    # Host-side scalar state (matches torch exactly, including the one-step
    # overshoot past max_r_max / max_d_max).
    new_r_max = r_max + r_max_inc_step * N if r_max < max_r_max else r_max
    new_d_max = d_max + d_max_inc_step * N if d_max < max_d_max else d_max

    return (y,
            new_rm.reshape(1, C, 1, 1),
            new_rs.reshape(1, C, 1, 1),
            new_r_max, new_d_max)


# ----------------------------- reference -------------------------------------


def _reference(x, gamma, beta, rmean, rstd, eps, momentum, r_max, d_max):
    """Pure-JAX mirror of the torch training branch."""
    x = x.astype(jnp.float32)
    mean = jnp.mean(x, axis=(0, 2, 3), keepdims=True)
    var = jnp.var(x, axis=(0, 2, 3), keepdims=True)          # unbiased=False
    std = jnp.sqrt(var + eps)
    r = jnp.clip(std / rstd, 1.0 / r_max, r_max)
    d = jnp.clip((mean - rmean) / rstd, -d_max, d_max)
    xh = (x - mean) * r / std + d
    y = gamma * xh + beta
    new_rm = rmean + momentum * (mean - rmean)
    new_rs = rstd + momentum * (std - rstd)
    return y, new_rm, new_rs


# ----------------------------- self-test --------------------------------------


if __name__ == "__main__":
    master = jax.random.PRNGKey(0)
    case_keys = jax.random.split(master, 4)

    def run_case(shape, r_max, d_max, key, tile_budget=None):
        k_x, k_g, k_b, k_rm, k_rv = jax.random.split(key, 5)
        N, C, H, W = shape
        eps, momentum = 1e-5, 0.01

        x = 2.0 * jax.random.normal(k_x, shape, dtype=jnp.float32) + 0.5
        gamma = 1.0 + 0.1 * jax.random.normal(k_g, (1, C, 1, 1), jnp.float32)
        beta = 0.1 * jax.random.normal(k_b, (1, C, 1, 1), jnp.float32)
        running_mean = 0.3 * jax.random.normal(k_rm, (1, C, 1, 1), jnp.float32)
        running_var = 0.5 + jax.random.uniform(k_rv, (1, C, 1, 1), jnp.float32)
        running_std = jnp.sqrt(running_var)   # torch stores sqrt(running_var)

        y, new_rm, new_rs, _, _ = batch_renorm2d_train(
            x, gamma, beta, running_mean, running_std,
            eps=eps, momentum=momentum, r_max=r_max, d_max=d_max,
            _tile_budget_bytes=tile_budget)
        jax.block_until_ready((y, new_rm, new_rs))

        y_ref, rm_ref, rs_ref = _reference(
            x, gamma, beta, running_mean, running_std, eps, momentum,
            r_max, d_max)

        assert jnp.allclose(y, y_ref, atol=1e-4, rtol=1e-4), \
            f"output mismatch {shape} r_max={r_max} d_max={d_max}"
        assert jnp.allclose(new_rm, rm_ref, atol=1e-5, rtol=1e-4), \
            "running mean mismatch"
        assert jnp.allclose(new_rs, rs_ref, atol=1e-5, rtol=1e-4), \
            "running std mismatch"

    # 1) module-default clamps (r == 1, d == 0)
    run_case((2, 4, 16, 16), r_max=1.0, d_max=0.0, key=case_keys[0])
    # 2) active r / d clamping
    run_case((2, 4, 16, 16), r_max=1.5, d_max=0.5, key=case_keys[1])
    # 3) spatial size not a multiple of 128 (full-HW lane-tile fallback)
    run_case((2, 8, 7, 7), r_max=2.0, d_max=1.0, key=case_keys[2])
    # 4) tiny forced VMEM budget -> exercises C-blocking + multi-HW-tile
    #    accumulation (grid (2, 2, 2), c_tile=8, hw_tile=128)
    run_case((2, 16, 8, 32), r_max=1.5, d_max=0.5, key=case_keys[3],
             tile_budget=4096)

    print("KERNEL_OK")
</pallas_src>

<mosaic_0001>
module attributes {stable_mosaic.version = 11 : i64} {
  func.func @_stats_kernel(%arg0: i32, %arg1: i32, %arg2: i32, %arg3: memref<1x4x256xf32, #tpu.memory_space<vmem>>, %arg4: memref<1x4x1xf32, #tpu.memory_space<vmem>>, %arg5: memref<1x4x1xf32, #tpu.memory_space<vmem>>, %arg6: memref<1x4x1xf32, #tpu.memory_space<vmem>>) attributes {dimension_semantics = [#tpu.dimension_semantics<parallel>, #tpu.dimension_semantics<parallel>, #tpu.dimension_semantics<arbitrary>], iteration_bounds = array<i64: 2, 1, 1>, scalar_prefetch = 0 : i64, scratch_operands = 0 : i64, tpu.core_type = #tpu.core_type<tc>, window_params = [{transform_indices = @transform_0, window_bounds = array<i64: 1, 4, 256>}, {transform_indices = @transform_1, window_bounds = array<i64: 1, 4, 1>}, {transform_indices = @transform_2, window_bounds = array<i64: 1, 4, 1>}, {transform_indices = @transform_3, window_bounds = array<i64: 1, 4, 1>}]} {
    %c0_i32 = arith.constant 0 : i32
    %0 = arith.cmpi eq, %arg2, %c0_i32 : i32
    %1 = arith.extui %0 : i1 to i32
    %c0_i32_0 = arith.constant 0 : i32
    %2 = arith.cmpi ne, %1, %c0_i32_0 : i32
    scf.if %2 {
      %cst_19 = arith.constant 0.000000e+00 : f32
      %18 = vector.broadcast %cst_19 : f32 to vector<1x4x1xf32>
      %c0_20 = arith.constant 0 : index
      %c0_21 = arith.constant 0 : index
      %c0_22 = arith.constant 0 : index
      %19 = vector.load %arg5[%c0_20, %c0_21, %c0_22] : memref<1x4x1xf32, #tpu.memory_space<vmem>>, vector<1x4x1xf32>
      tpu.vector_store %arg5[%c0_20, %c0_21, %c0_22], %18 {strides = array<i32>} : memref<1x4x1xf32, #tpu.memory_space<vmem>>, vector<1x4x1xf32>,
      %cst_23 = arith.constant 0.000000e+00 : f32
      %20 = vector.broadcast %cst_23 : f32 to vector<1x4x1xf32>
      %c0_24 = arith.constant 0 : index
      %c0_25 = arith.constant 0 : index
      %c0_26 = arith.constant 0 : index
      %21 = vector.load %arg6[%c0_24, %c0_25, %c0_26] : memref<1x4x1xf32, #tpu.memory_space<vmem>>, vector<1x4x1xf32>
      tpu.vector_store %arg6[%c0_24, %c0_25, %c0_26], %20 {strides = array<i32>} : memref<1x4x1xf32, #tpu.memory_space<vmem>>, vector<1x4x1xf32>,
    } else {
    }
    %c0 = arith.constant 0 : index
    %c0_1 = arith.constant 0 : index
    %c0_2 = arith.constant 0 : index
    %3 = vector.load %arg3[%c0, %c0_1, %c0_2] : memref<1x4x256xf32, #tpu.memory_space<vmem>>, vector<1x4x256xf32>
    %c0_3 = arith.constant 0 : index
    %c0_4 = arith.constant 0 : index
    %c0_5 = arith.constant 0 : index
    %4 = vector.load %arg4[%c0_3, %c0_4, %c0_5] : memref<1x4x1xf32, #tpu.memory_space<vmem>>, vector<1x4x1xf32>
    %5 = vector.broadcast %4 : vector<1x4x1xf32> to vector<1x4x256xf32>
    %6 = arith.subf %3, %5 : vector<1x4x256xf32>
    %c0_6 = arith.constant 0 : index
    %c0_7 = arith.constant 0 : index
    %c0_8 = arith.constant 0 : index
    %7 = vector.load %arg5[%c0_6, %c0_7, %c0_8] : memref<1x4x1xf32, #tpu.memory_space<vmem>>, vector<1x4x1xf32>
    %cst = arith.constant dense<0.000000e+00> : vector<1x4xf32>
    %8 = vector.multi_reduction <add>, %6, %cst [2] : vector<1x4x256xf32> to vector<1x4xf32>
    %9 = vector.shape_cast %8 : vector<1x4xf32> to vector<1x4x1xf32>
    %10 = arith.addf %7, %9 : vector<1x4x1xf32>
    %c0_9 = arith.constant 0 : index
    %c0_10 = arith.constant 0 : index
    %c0_11 = arith.constant 0 : index
    %11 = vector.load %arg5[%c0_9, %c0_10, %c0_11] : memref<1x4x1xf32, #tpu.memory_space<vmem>>, vector<1x4x1xf32>
    tpu.vector_store %arg5[%c0_9, %c0_10, %c0_11], %10 {strides = array<i32>} : memref<1x4x1xf32, #tpu.memory_space<vmem>>, vector<1x4x1xf32>,
    %c0_12 = arith.constant 0 : index
    %c0_13 = arith.constant 0 : index
    %c0_14 = arith.constant 0 : index
    %12 = vector.load %arg6[%c0_12, %c0_13, %c0_14] : memref<1x4x1xf32, #tpu.memory_space<vmem>>, vector<1x4x1xf32>
    %13 = arith.mulf %6, %6 : vector<1x4x256xf32>
    %cst_15 = arith.constant dense<0.000000e+00> : vector<1x4xf32>
    %14 = vector.multi_reduction <add>, %13, %cst_15 [2] : vector<1x4x256xf32> to vector<1x4xf32>
    %15 = vector.shape_cast %14 : vector<1x4xf32> to vector<1x4x1xf32>
    %16 = arith.addf %12, %15 : vector<1x4x1xf32>
    %c0_16 = arith.constant 0 : index
    %c0_17 = arith.constant 0 : index
    %c0_18 = arith.constant 0 : index
    %17 = vector.load %arg6[%c0_16, %c0_17, %c0_18] : memref<1x4x1xf32, #tpu.memory_space<vmem>>, vector<1x4x1xf32>
    tpu.vector_store %arg6[%c0_16, %c0_17, %c0_18], %16 {strides = array<i32>} : memref<1x4x1xf32, #tpu.memory_space<vmem>>, vector<1x4x1xf32>,
    return
  }
  func.func @transform_0(%arg0: i32, %arg1: i32, %arg2: i32) -> (i32, i32, i32) {
    %c0_i32 = arith.constant 0 : i32
    return %arg0, %arg1, %arg2 : i32, i32, i32
  }
  func.func @transform_1(%arg0: i32, %arg1: i32, %arg2: i32) -> (i32, i32, i32) {
    %c0_i32 = arith.constant 0 : i32
    %c0_i32_0 = arith.constant 0 : i32
    %c0_i32_1 = arith.constant 0 : i32
    return %c0_i32, %arg1, %c0_i32_0 : i32, i32, i32
  }
  func.func @transform_2(%arg0: i32, %arg1: i32, %arg2: i32) -> (i32, i32, i32) {
    %c0_i32 = arith.constant 0 : i32
    %c0_i32_0 = arith.constant 0 : i32
    return %arg0, %arg1, %c0_i32 : i32, i32, i32
  }
  func.func @transform_3(%arg0: i32, %arg1: i32, %arg2: i32) -> (i32, i32, i32) {
    %c0_i32 = arith.constant 0 : i32
    %c0_i32_0 = arith.constant 0 : i32
    return %arg0, %arg1, %c0_i32 : i32, i32, i32
  }
}

</mosaic_0001>

<bundles_post_ra>
// kernel: tpu_custom_call.1
= control target key start
LH: loop header
LB: loop body
LE: loop exit
PB: predicated region body
PF: predicated region fallthrough
CT: control target
= control target key end

     0   :  { %9 = vsyncpa [#allocation3], 0  ;;  %s749_s0 = inlined_call_operand.hbm [shape: f32[2,4,256], index: 0, kind: input, shape index: {}]   ;;  %s750_s1 = inlined_call_operand.vmem [shape: f32[1,4,1], index: 1, kind: input, shape index: {}]   ;;  %s751_s2 = inlined_call_operand.vmem [shape: f32[2,4,1], index: 2, kind: output, shape index: {0}]   ;;  %s752_s3 = inlined_call_operand.vmem [shape: f32[2,4,1], index: 3, kind: output, shape index: {1}]  }
   0x1   :  { %11 = vsyncpa [#allocation3 + $0x1], 0  ;;  %s631_s12 = smov 0   ;;  %s633_s13 = smov 0  }
   0x2   :  { %s635_s14 = smov 0   ;;  %s637_s15 = smov 0  }
   0x3   :  { %s639_s16 = smov 0   ;;  %s641_s17 = smov 0  }
   0x4 LB: > { %s453_s18 = sadd.s32 4294967295, %s605_s17   ;;  %s36_s19 = sadd.s32 1, %s601_s16  ;;  %s605_s17 = sphi %s641_s17, %s17_s17   ;;  %s601_s16 = sphi %s639_s16, %s760_s16   ;;  %s597_s15 = sphi %s637_s15, %s759_s15   ;;  %s593_s14 = sphi %s635_s14, %s758_s14   ;;  %s589_s13 = sphi %s633_s13, %s757_s13   ;;  %s585_s12 = sphi %s631_s12, %s756_s12  }
   0x5   : > { %p38_p0 = scmp.ge.s32.totalorder %s36_s19, 2  ;;  %s47_s20 = sadd.s32 1, %s593_s14 }
   0x6   : > { %p54_p1 = scmp.ne.s32.totalorder %s593_s14, %s589_s13  ;;  %p55_p2 = scmp.eq.s32.totalorder %s605_s17, 0 }
   0x7   : > { %s762_s19 = smov (%p38_p0, %s36_s19), 0  ;;  %p60_p4 = scmp.ne.s32.totalorder %s589_s13, %s585_s12 }
   0x8   : > { %p667_p3 = por %p55_p2, %p54_p1  ;;  %s40_s22 = ssub.s32 %s601_s16, %s762_s19 }
   0x9   : > { %p61_p5 = scmp.eq.s32.totalorder %s453_s18, 0  ;;  %p45_p6 = scmp.eq.s32.totalorder %s40_s22, 0 }
   0xa   : > { %p474_p8 = scmp.lt.s32.totalorder %s605_s17, 2  ;;  %s173_s25 = sand.u32 1, %s593_s14  }
   0xb   : > { %p674_p7 = por %p61_p5, %p60_p4  ;;  %s467_s26 = sshll.u32 %s601_s16, 7 }
   0xc   : > { %s680_s24 = scalar_select %p45_p6, %s593_s14, %s47_s20  }
   0xd   : > { %s458_s27 = sshll.u32 %s173_s25, 3  ;;  %s187_s30 = scalar_lea.hbm %s749_s0, %s467_s26 }
   0xe   : > { %s177_s4 = scalar_lea.vmem [#allocation2], %s458_s27  ;;  %p689_p9 = pnand %p474_p8, %p667_p3 }
   0xf   : > { %s189_s5 = sshll.u32 %s177_s4, 4  ;;  %p461_p10 = scmp.ge.s32.totalorder %s605_s17, 1  ;;  %s190_s5 = int_to_ptr.vmem [resolvable:$true] %s189_s5 }
  0x10   : > { %p194_p11 = scmp.lt.s32.totalorder %s605_s17, 3  ;;  %s174_s7 = scalar_lea.sflag [#allocation3], %s173_s25 }
  0x11   : > { %p529_p12 = pneg %p689_p9  ;;  %s540_s8 = scalar_lea.vmem %s190_s5, 128 }
  0x12   : > { %p541_p13 = scmp.ne.s32.totalorder %s190_s5, %s540_s8  ;;  %s607_s9 = smov [#allocation2]  }
  0x13   : > { %s545_s10 = sshll.u32 %s607_s9, 4  ;;  %s546_s10 = int_to_ptr.vmem [resolvable:$false] %s545_s10 }
  0x14   : > { %p543_p0 = pnand %p541_p13, %p529_p12  ;;  %s547_s11 = scalar_lea.vmem %s546_s10, 256 }
  0x15   : > { %p548_p2 = scmp.lt.s32.totalorder %s190_s5, %s546_s10  ;;  %p549_p3 = scmp.lt.s32.totalorder %s547_s11, %s540_s8 }
  0x16   : > { %p544_p1 = pneg %p543_p0 }
  0x17   : > { %p550_p4 = por %p549_p3, %p548_p2 }
  0x19   : > { %p551_p5 = pnand %p550_p4, %p544_p1 }
  0x1b   : > { %554 = shalt.err (!%p551_p5)
}
  0x1c   : > { %473 = dma.hbm_to_vmem [thread:$0]  (!%p689_p9), %s187_s30, 128, %s190_s5, %s174_s7  }
  0x1d   : > { %p195_p6 = pnand %p461_p10, %p194_p11 }
  0x1e   : > { %s200_s12 = sand.u32 (!%p195_p6), 1, %s589_s13  }
  0x1f   : > { %198 = sbr.rel (%p195_p6) target bundleno = 315 (0x13b), region = 28  ;;  %s462_s18 = sshll.u32 (!%p195_p6), %s200_s12, 3 }
  0x20   : > { %s201_s20 = scalar_lea.sflag (!%p195_p6), [#allocation3], %s200_s12  ;;  %s204_s21 = scalar_lea.vmem (!%p195_p6), [#allocation2], %s462_s18 }
  0x24   : > { %580 = dma.done.wait (%p674_p7), %s201_s20, 128  }
  0x25   : > { %582 = vsyncadd (%p674_p7), %s201_s20, 4294967168  ;;  %v608_v0 = vmov 0   ;;  %v267_v1 = vld [vmem:[%s750_s1] sm:$0xf]  ;;  %p245_p8 = scmp.lt.s32.totalorder %s597_s15, 1  ;;  %vm263_vm0 = vcmask 3072   ;;  %v275_v5 = vlaneseq }
  0x26   : > { %526 = vset.pattern.permute.xlu0 %v608_v0  ;;  %v609_v2 = vmov 0.0   ;;  %v610_v3 = vmov 839922192   ;;  %v266_v10 = vld [vmem:[%s204_s21] sm:$0xff]  ;;  %vm285_vm1 = vcmask 1043456  }
  0x27   : > { %270 = vperm.xlu0 %526, %v267_v1   ;;  %s764_s15 = smov (!%p245_p8, %s597_s15), 1  ;;  %v273_v4 = vunpack.c.l.s4 %v610_v3  ;;  %v276_v7 = vshrl.u32 %v275_v5, 7 }
  0x28   : > { %s463_s26 = sshll.u32 %s764_s15, 2 }
  0x29   : > { %s719_s23 = scalar_lea.vmem %s751_s2, %s463_s26  ;;  %v274_v6 = vunpack.c.0.s8 %v273_v4  ;;  %s258_s30 = scalar_lea.vmem %s752_s3, %s463_s26 }
  0x2a   : > { %264 = vst.msk [vmem:[%s719_s23] sm:$0xf] %vm263_vm0, %v609_v2  ;;  %265 = vst.msk [vmem:[%s258_s30] sm:$0xf] %vm263_vm0, %v609_v2 }
  0x2b   : > { %v277_v8 = vsub.s32 %v274_v6, %v276_v7 }
  0x31   : > { %v281_v22 = vld [vmem:[%s719_s23] sm:$0xf] }
  0x32   : > { %v294_v24 = vld [vmem:[%s258_s30] sm:$0xf] }
  0xa2   : > { %v271_v9 = vpop.permute.xlu0 %270 }
  0xa3   : > { %v278_v11 = vrot.slane %v271_v9, %v277_v8 }
  0xa5   : > { %v280_v12 = vsub.f32 %v266_v10, %v278_v11 }
  0xa7   : > { %v283_v13 = vcombine.high %v280_v12, %v280_v12  ;;  %v295_v14 = vmul.f32 %v280_v12, %v280_v12  ;;  %v286_v15 = vsel %vm285_vm1, %v280_v12, 0.0 }
  0xa9   : > { %v287_v16 = vsel %vm285_vm1, %v283_v13, 0.0  ;;  %v297_v17 = vcombine.high %v295_v14, %v295_v14  ;;  %v299_v19 = vsel %vm285_vm1, %v295_v14, 0.0 }
  0xaa   : > { %v288_v18 = vadd.f32 %v287_v16, %v286_v15 }
  0xab   : > { %v300_v20 = vsel %vm285_vm1, %v297_v17, 0.0 }
  0xac   : > { %289 = vadd.xlane.f32.xlu0 %v288_v18  ;;  %v301_v21 = vadd.f32 %v300_v20, %v299_v19 }
  0xae   : > { %302 = vadd.xlane.f32.xlu1 %v301_v21 }
 0x135   : > { %v290_v23 = vpop.xlane.xlu0 %289 }
 0x136   : > { %v291_v25 = vadd.f32 %v290_v23, %v281_v22 }
 0x137   : > { %v303_v26 = vpop.xlane.xlu1 %302 }
 0x138   : > { %293 = vst.msk [vmem:[%s719_s23] sm:$0xf] %vm263_vm0, %v291_v25  ;;  %v304_v27 = vadd.f32 %v303_v26, %v294_v24 }
 0x13a   : > { %305 = vst.msk [vmem:[%s258_s30] sm:$0xf] %vm263_vm0, %v304_v27 }
 0x13b PF: > { %s17_s17 = sadd.s32 1, %s605_s17   ;;  %s756_s12 = smov %s589_s13 }
 0x13c   : > { %p14_p7 = scmp.ge.s32.totalorder %s17_s17, 4   ;;  %s757_s13 = smov %s593_s14 }
 0x13d   : > { %s758_s14 = smov %s680_s24  ;;  %s759_s15 = smov %s601_s16 }
 0x13e   : > { %s760_s16 = smov %s762_s19  ;;  %16 = sbr.rel (!%p14_p7) target bundleno = 4 (0x4), region = 87 }
 0x143   :  { %351 = vsyncpa [#allocation3], 1 }
 0x144   :  { %353 = vsyncpa [#allocation3 + $0x1], 1 }

</bundles_post_ra>
